<compile_context>
chip_gen: v7x
topology: tpu7x:2x2x1
jax: 0.10.0
libtpu: 0.0.40
codegen_flags: <defaults>
</compile_context>

<pallas_src>
import jax
import jax.numpy as jnp
from jax import lax
from jax.experimental import pallas as pl
from jax.experimental.pallas import tpu as pltpu

BN_EPS = 1e-5
_VMEM_LIMIT_BYTES = 48 * 1024 * 1024      # leaves headroom under v7x's 64 MiB
_FUSED_VMEM_BUDGET = 40 * 1024 * 1024     # when to fall back to per-layer path


# --------------------------------------------------------------------------
# helpers
# --------------------------------------------------------------------------
def _round_up(x, m):
    return ((x + m - 1) // m) * m


def _pick_tile(dim_padded, prefs=(256, 128)):
    for p in prefs:
        if dim_padded % p == 0:
            return p
    return dim_padded  # only hit for small dims (< 128, already multiple of 8)


def _affine_from_params(p):
    """Fold Linear bias + (optional) eval-mode BatchNorm into (scale, shift)."""
    if "gamma" in p:
        scale = p["gamma"] * lax.rsqrt(p["var"] + BN_EPS)
        shift = (p["b"] - p["mean"]) * scale + p["beta"]
    else:  # use_bn=False variant of the module
        scale = jnp.ones_like(p["b"])
        shift = p["b"]
    return scale, shift


# --------------------------------------------------------------------------
# Fully fused MLP kernel: all layers in one pallas_call, activation in VMEM
# --------------------------------------------------------------------------
def _fused_mlp_kernel(x_ref, w_ref, shift_ref, o_ref, act_ref):
    l = pl.program_id(1)
    n_layers = pl.num_programs(1)

    @pl.when(l == 0)
    def _():
        act_ref[...] = x_ref[...].astype(act_ref.dtype)

    # bf16 x bf16 matmul on the MXU, f32 accumulation
    y = jnp.dot(act_ref[...], w_ref[0], preferred_element_type=jnp.float32)
    y = jnp.maximum(y + shift_ref[0], 0.0)  # fused (bias+BN) affine + ReLU

    @pl.when(l < n_layers - 1)
    def _():
        act_ref[...] = y.astype(act_ref.dtype)

    @pl.when(l == n_layers - 1)
    def _():
        o_ref[...] = y.astype(o_ref.dtype)


def _fused_mlp(params, x2, d_in0, d_pad, m_pad, tm):
    m = x2.shape[0]
    n_layers = len(params)
    d_out_last = int(params[-1]["w"].shape[0])

    # Stack all layer weights/shifts into lane-dense, zero-padded slabs.
    # Zero padding keeps padded lanes of the activation exactly 0 across
    # layers (0-rows/cols of W, 0 shift, ReLU(0)=0).
    w_all = jnp.zeros((n_layers, d_pad, d_pad), jnp.bfloat16)
    s_all = jnp.zeros((n_layers, 1, d_pad), jnp.float32)
    for l, p in enumerate(params):
        d_out, d_in = p["w"].shape
        scale, shift = _affine_from_params(p)
        w_scaled = p["w"].T * scale[None, :]          # [in, out], scale folded in
        w_all = w_all.at[l, :d_in, :d_out].set(w_scaled.astype(jnp.bfloat16))
        s_all = s_all.at[l, 0, :d_out].set(shift.astype(jnp.float32))

    xp = jnp.zeros((m_pad, d_pad), jnp.bfloat16)
    xp = xp.at[:m, :d_in0].set(x2.astype(jnp.bfloat16))

    out = pl.pallas_call(
        _fused_mlp_kernel,
        out_shape=jax.ShapeDtypeStruct((m_pad, d_pad), jnp.float32),
        grid_spec=pltpu.PrefetchScalarGridSpec(
            num_scalar_prefetch=0,
            grid=(m_pad // tm, n_layers),
            in_specs=[
                pl.BlockSpec((tm, d_pad), lambda i, l: (i, 0)),
                pl.BlockSpec((1, d_pad, d_pad), lambda i, l: (l, 0, 0)),
                pl.BlockSpec((1, 1, d_pad), lambda i, l: (l, 0, 0)),
            ],
            out_specs=pl.BlockSpec((tm, d_pad), lambda i, l: (i, 0)),
            scratch_shapes=[pltpu.VMEM((tm, d_pad), jnp.bfloat16)],
        ),
        compiler_params=pltpu.CompilerParams(
            dimension_semantics=("parallel", "arbitrary"),
            vmem_limit_bytes=_VMEM_LIMIT_BYTES),
    )(xp, w_all, s_all)

    return out[:m, :d_out_last].astype(x2.dtype)


# --------------------------------------------------------------------------
# Fallback: per-layer tiled Linear + affine + ReLU (for large feature dims)
# --------------------------------------------------------------------------
def _linear_affine_relu_kernel(x_ref, w_ref, shift_ref, o_ref, acc_ref):
    k = pl.program_id(2)

    @pl.when(k == 0)
    def _():
        acc_ref[...] = jnp.zeros_like(acc_ref)

    acc_ref[...] += jnp.dot(x_ref[...], w_ref[...],
                            preferred_element_type=jnp.float32)

    @pl.when(k == pl.num_programs(2) - 1)
    def _():
        y = acc_ref[...] + shift_ref[...]           # scale already folded into W
        o_ref[...] = jnp.maximum(y, 0.0).astype(o_ref.dtype)


def linear_affine_relu(x, w_io_scaled, shift, *, out_dtype=None):
    """y = relu(x @ w_io_scaled + shift);  x:[M,K], w_io_scaled:[K,N]."""
    m, k = x.shape
    k2, n = w_io_scaled.shape
    assert k == k2
    out_dtype = out_dtype if out_dtype is not None else x.dtype

    m_pad = _round_up(m, 8) if m <= 256 else _round_up(m, 128)
    k_pad = _round_up(k, 128)
    n_pad = _round_up(n, 128)
    tm = _pick_tile(m_pad)
    tk = _pick_tile(k_pad)
    tn = _pick_tile(n_pad)

    xp = jnp.zeros((m_pad, k_pad), jnp.bfloat16).at[:m, :k].set(
        x.astype(jnp.bfloat16))
    wp = jnp.zeros((k_pad, n_pad), jnp.bfloat16).at[:k, :n].set(
        w_io_scaled.astype(jnp.bfloat16))
    sp = jnp.zeros((1, n_pad), jnp.float32).at[0, :n].set(
        shift.astype(jnp.float32))

    out = pl.pallas_call(
        _linear_affine_relu_kernel,
        out_shape=jax.ShapeDtypeStruct((m_pad, n_pad), out_dtype),
        grid_spec=pltpu.PrefetchScalarGridSpec(
            num_scalar_prefetch=0,
            grid=(m_pad // tm, n_pad // tn, k_pad // tk),
            in_specs=[
                pl.BlockSpec((tm, tk), lambda i, j, kk: (i, kk)),
                pl.BlockSpec((tk, tn), lambda i, j, kk: (kk, j)),
                pl.BlockSpec((1, tn), lambda i, j, kk: (0, j)),
            ],
            out_specs=pl.BlockSpec((tm, tn), lambda i, j, kk: (i, j)),
            scratch_shapes=[pltpu.VMEM((tm, tn), jnp.float32)],
        ),
        compiler_params=pltpu.CompilerParams(
            dimension_semantics=("parallel", "parallel", "arbitrary"),
            vmem_limit_bytes=_VMEM_LIMIT_BYTES),
    )(xp, wp, sp)
    return out[:m, :n]


# --------------------------------------------------------------------------
# Public forward
# --------------------------------------------------------------------------
def mlp_forward(params, x, *, force_per_layer=False):
    """x: [bs, *, dim_0] -> [bs, *, dim_L]  (Linear -> BN(eval) -> ReLU per layer)."""
    *lead, d_in0 = x.shape
    x2 = x.reshape(-1, d_in0)
    m = x2.shape[0]

    all_dims = [d_in0] + [int(p["w"].shape[0]) for p in params]
    d_out_last = all_dims[-1]
    d_pad = _round_up(max(all_dims), 128)
    m_pad = _round_up(m, 8) if m <= 256 else _round_up(m, 128)
    tm = _pick_tile(m_pad)

    # Fused-path VMEM footprint (double-buffered blocks + activation scratch).
    fused_vmem = (2 * d_pad * d_pad * 2      # weights, bf16
                  + 2 * tm * d_pad * 2       # x in, bf16
                  + 2 * tm * d_pad * 4       # out, f32
                  + tm * d_pad * 2           # activation scratch, bf16
                  + 2 * d_pad * 4)           # shift, f32

    if (not force_per_layer) and fused_vmem <= _FUSED_VMEM_BUDGET:
        y = _fused_mlp(params, x2, d_in0, d_pad, m_pad, tm)
    else:
        y = x2
        for p in params:
            scale, shift = _affine_from_params(p)
            w_scaled = p["w"].T * scale[None, :]
            y = linear_affine_relu(y, w_scaled, shift, out_dtype=x.dtype)
    return y.reshape(*lead, d_out_last)


# --------------------------------------------------------------------------
# Params + pure-JAX reference
# --------------------------------------------------------------------------
def init_mlp_params(key, dims):
    """Deterministic synthetic params matching nn.Linear + nn.BatchNorm1d shapes."""
    params = []
    for i in range(len(dims) - 1):
        d_in, d_out = dims[i], dims[i + 1]
        key, kw, kb, kg, kbt, km, kv = jax.random.split(key, 7)
        bound = 1.0 / jnp.sqrt(d_in)
        w = jax.random.uniform(kw, (d_out, d_in), jnp.float32, -bound, bound)  # [out, in]
        b = jax.random.uniform(kb, (d_out,), jnp.float32, -bound, bound)
        gamma = 1.0 + 0.1 * jax.random.normal(kg, (d_out,), jnp.float32)
        beta = 0.1 * jax.random.normal(kbt, (d_out,), jnp.float32)
        running_mean = 0.1 * jax.random.normal(km, (d_out,), jnp.float32)
        running_var = 1.0 + 0.1 * jnp.abs(jax.random.normal(kv, (d_out,), jnp.float32))
        params.append(dict(w=w, b=b, gamma=gamma, beta=beta,
                           mean=running_mean, var=running_var))
    return params


def mlp_reference(params, x):
    """Pure-JAX f32 reference of the same forward (for verification)."""
    for p in params:
        y = x @ p["w"].T + p["b"]
        if "gamma" in p:
            y = (y - p["mean"]) / jnp.sqrt(p["var"] + BN_EPS) * p["gamma"] + p["beta"]
        x = jnp.maximum(y, 0.0)
    return x


if __name__ == "__main__":
    # Small shapes consistent with the module: MLP(dims=[32, 64, 48, 16], n_layers=3)
    dims = [32, 64, 48, 16]
    batch = 8
    key = jax.random.PRNGKey(0)
    key, kx = jax.random.split(key)
    x = jax.random.normal(kx, (batch, dims[0]), jnp.float32)
    params = init_mlp_params(key, dims)

    ref = mlp_reference(params, x)

    # Fully fused single-kernel path (the fast path for these shapes).
    out_fused = jax.block_until_ready(mlp_forward(params, x))
    assert out_fused.shape == (batch, dims[-1])
    # bf16 MXU inputs -> loosened tolerance vs the f32 reference.
    assert jnp.allclose(out_fused, ref, atol=5e-2, rtol=5e-2), \
        "fused-MLP kernel mismatch vs reference"

    # Per-layer tiled fallback path (exercised explicitly for coverage).
    out_layered = jax.block_until_ready(mlp_forward(params, x, force_per_layer=True))
    assert out_layered.shape == (batch, dims[-1])
    assert jnp.allclose(out_layered, ref, atol=5e-2, rtol=5e-2), \
        "per-layer kernel mismatch vs reference"

    print("KERNEL_OK")
</pallas_src>

<mosaic_0001>
module attributes {stable_mosaic.version = 11 : i64} {
  func.func @_fused_mlp_kernel(%arg0: i32, %arg1: i32, %arg2: memref<8x128xbf16, #tpu.memory_space<vmem>>, %arg3: memref<1x128x128xbf16, #tpu.memory_space<vmem>>, %arg4: memref<1x1x128xf32, #tpu.memory_space<vmem>>, %arg5: memref<8x128xf32, #tpu.memory_space<vmem>>, %arg6: memref<8x128xbf16, #tpu.memory_space<vmem>>) attributes {dimension_semantics = [#tpu.dimension_semantics<parallel>, #tpu.dimension_semantics<arbitrary>], iteration_bounds = array<i64: 1, 3>, scalar_prefetch = 0 : i64, scratch_operands = 1 : i64, tpu.core_type = #tpu.core_type<tc>, window_params = [{transform_indices = @transform_0, window_bounds = array<i64: 8, 128>}, {transform_indices = @transform_1, window_bounds = array<i64: 1, 128, 128>}, {transform_indices = @transform_2, window_bounds = array<i64: 1, 1, 128>}, {transform_indices = @transform_3, window_bounds = array<i64: 8, 128>}]} {
    %c0_i32 = arith.constant 0 : i32
    %0 = arith.cmpi eq, %arg1, %c0_i32 : i32
    %1 = arith.extui %0 : i1 to i32
    %c0_i32_0 = arith.constant 0 : i32
    %2 = arith.cmpi ne, %1, %c0_i32_0 : i32
    scf.if %2 {
      %c0_12 = arith.constant 0 : index
      %c0_13 = arith.constant 0 : index
      %19 = vector.load %arg2[%c0_12, %c0_13] : memref<8x128xbf16, #tpu.memory_space<vmem>>, vector<8x128xbf16>
      %c0_14 = arith.constant 0 : index
      %c0_15 = arith.constant 0 : index
      %20 = vector.load %arg6[%c0_14, %c0_15] : memref<8x128xbf16, #tpu.memory_space<vmem>>, vector<8x128xbf16>
      tpu.vector_store %arg6[%c0_14, %c0_15], %19 {strides = array<i32>} : memref<8x128xbf16, #tpu.memory_space<vmem>>, vector<8x128xbf16>,
    } else {
    }
    %c0 = arith.constant 0 : index
    %c0_1 = arith.constant 0 : index
    %3 = vector.load %arg6[%c0, %c0_1] : memref<8x128xbf16, #tpu.memory_space<vmem>>, vector<8x128xbf16>
    %c0_2 = arith.constant 0 : index
    %c0_3 = arith.constant 0 : index
    %c0_4 = arith.constant 0 : index
    %4 = vector.load %arg3[%c0_2, %c0_3, %c0_4] : memref<1x128x128xbf16, #tpu.memory_space<vmem>>, vector<1x128x128xbf16>
    %5 = vector.shape_cast %4 : vector<1x128x128xbf16> to vector<128x128xbf16>
    %cst = arith.constant dense<0.000000e+00> : vector<8x128xf32>
    %6 = tpu.matmul %3, %5, %cst {dimension_numbers = #tpu.dot_dimension_numbers<[1], [0], [0], [1], [0, 0, 1, 1], [], []>} : vector<8x128xbf16>, vector<128x128xbf16>, vector<8x128xf32> -> vector<8x128xf32>
    %c0_5 = arith.constant 0 : index
    %c0_6 = arith.constant 0 : index
    %c0_7 = arith.constant 0 : index
    %7 = vector.load %arg4[%c0_5, %c0_6, %c0_7] : memref<1x1x128xf32, #tpu.memory_space<vmem>>, vector<1x1x128xf32>
    %8 = vector.shape_cast %7 : vector<1x1x128xf32> to vector<1x128xf32>
    %9 = vector.broadcast %8 : vector<1x128xf32> to vector<8x128xf32>
    %10 = arith.addf %6, %9 : vector<8x128xf32>
    %cst_8 = arith.constant 0.000000e+00 : f32
    %11 = vector.broadcast %cst_8 : f32 to vector<8x128xf32>
    %12 = arith.maximumf %10, %11 : vector<8x128xf32>
    %c2_i32 = arith.constant 2 : i32
    %13 = arith.cmpi slt, %arg1, %c2_i32 : i32
    %14 = arith.extui %13 : i1 to i32
    %c0_i32_9 = arith.constant 0 : i32
    %15 = arith.cmpi ne, %14, %c0_i32_9 : i32
    scf.if %15 {
      %19 = arith.truncf %12 : vector<8x128xf32> to vector<8x128xbf16>
      %c0_12 = arith.constant 0 : index
      %c0_13 = arith.constant 0 : index
      %20 = vector.load %arg6[%c0_12, %c0_13] : memref<8x128xbf16, #tpu.memory_space<vmem>>, vector<8x128xbf16>
      tpu.vector_store %arg6[%c0_12, %c0_13], %19 {strides = array<i32>} : memref<8x128xbf16, #tpu.memory_space<vmem>>, vector<8x128xbf16>,
    } else {
    }
    %c2_i32_10 = arith.constant 2 : i32
    %16 = arith.cmpi eq, %arg1, %c2_i32_10 : i32
    %17 = arith.extui %16 : i1 to i32
    %c0_i32_11 = arith.constant 0 : i32
    %18 = arith.cmpi ne, %17, %c0_i32_11 : i32
    scf.if %18 {
      %c0_12 = arith.constant 0 : index
      %c0_13 = arith.constant 0 : index
      %19 = vector.load %arg5[%c0_12, %c0_13] : memref<8x128xf32, #tpu.memory_space<vmem>>, vector<8x128xf32>
      tpu.vector_store %arg5[%c0_12, %c0_13], %12 {strides = array<i32>} : memref<8x128xf32, #tpu.memory_space<vmem>>, vector<8x128xf32>,
    } else {
    }
    return
  }
  func.func @transform_0(%arg0: i32, %arg1: i32) -> (i32, i32) {
    %c0_i32 = arith.constant 0 : i32
    %c0_i32_0 = arith.constant 0 : i32
    return %arg0, %c0_i32 : i32, i32
  }
  func.func @transform_1(%arg0: i32, %arg1: i32) -> (i32, i32, i32) {
    %c0_i32 = arith.constant 0 : i32
    %c0_i32_0 = arith.constant 0 : i32
    %c0_i32_1 = arith.constant 0 : i32
    return %arg1, %c0_i32, %c0_i32_0 : i32, i32, i32
  }
  func.func @transform_2(%arg0: i32, %arg1: i32) -> (i32, i32, i32) {
    %c0_i32 = arith.constant 0 : i32
    %c0_i32_0 = arith.constant 0 : i32
    %c0_i32_1 = arith.constant 0 : i32
    return %arg1, %c0_i32, %c0_i32_0 : i32, i32, i32
  }
  func.func @transform_3(%arg0: i32, %arg1: i32) -> (i32, i32) {
    %c0_i32 = arith.constant 0 : i32
    %c0_i32_0 = arith.constant 0 : i32
    return %arg0, %c0_i32 : i32, i32
  }
}

</mosaic_0001>

<bundles_post_ra>
// kernel: tpu_custom_call.1
= control target key start
LH: loop header
LB: loop body
LE: loop exit
PB: predicated region body
PF: predicated region fallthrough
CT: control target
= control target key end

     0   :  { %8 = vsyncpa [#allocation4], 0  ;;  %s985_s0 = inlined_call_operand.hbm [shape: bf16[8,128], index: 0, kind: input, shape index: {}]   ;;  %s986_s1 = inlined_call_operand.hbm [shape: bf16[3,128,128], index: 1, kind: input, shape index: {}]   ;;  %s987_s2 = inlined_call_operand.vmem [shape: f32[3,1,128], index: 2, kind: input, shape index: {}]   ;;  %s988_s3 = inlined_call_operand.hbm [shape: f32[8,128], index: 3, kind: output, shape index: {}]  }
   0x1   :  { %9 = vsyncpa [#allocation7], 0 }
   0x2   :  { %11 = vsyncpa [#allocation7 + $0x1], 0 }
   0x3   :  { %12 = vsyncpa [#allocation5], 0  ;;  %s764_s12 = smov 0   ;;  %s766_s13 = smov 0  }
   0x4   :  { %s768_s14 = smov 0   ;;  %s770_s15 = smov 0  }
   0x5   :  { %s772_s16 = smov 0   ;;  %s774_s17 = smov 0  }
   0x6 LB: > { %s452_s18 = sadd.s32 4294967295, %s735_s17   ;;  %s63_s19 = sadd.s32 1, %s723_s14  ;;  %s735_s17 = sphi %s774_s17, %s18_s17   ;;  %s731_s16 = sphi %s772_s16, %s1009_s16   ;;  %s727_s15 = sphi %s770_s15, %s1008_s15   ;;  %s723_s14 = sphi %s768_s14, %s1007_s14   ;;  %s719_s13 = sphi %s766_s13, %s1006_s13   ;;  %s715_s12 = sphi %s764_s12, %s1005_s12  }
   0x7   : > { %p70_p0 = scmp.ne.s32.totalorder %s723_s14, %s719_s13  ;;  %p71_p1 = scmp.eq.s32.totalorder %s735_s17, 0 }
   0x8   : > { %p76_p2 = scmp.ne.s32.totalorder %s719_s13, %s715_s12  ;;  %p800_p3 = scmp.eq.s32.totalorder %s452_s18, 0 }
   0x9   : > { %p72_p4 = por %p71_p1, %p70_p0  ;;  %p453_p5 = scmp.ge.s32.totalorder %s735_s17, 1 }
   0xa   : > { %s994_s20 = scalar_select %p800_p3, 1, 0 }
   0xb   : > { %p807_p6 = por %p800_p3, %p76_p2  ;;  %p139_p7 = scmp.lt.s32.totalorder %s735_s17, 4 }
   0xc   : > { %s737_s23 = smov [#allocation3]   ;;  %p527_p10 = scmp.lt.s32.totalorder %s735_s17, 3 }
   0xd   : > { %s995_s21 = scalar_select %p807_p6, 1, 0 }
   0xe   : > { %p812_p8 = pnand %p453_p5, %p139_p7  ;;  %s154_s24 = sshll.u32 %s737_s23, 4  ;;  %s155_s24 = int_to_ptr.vmem [resolvable:$true] %s154_s24 }
   0xf   : > { %s165_s25 = sand.u32 1, %s723_s14   ;;  %p826_p12 = pnand %p527_p10, %p72_p4 }
  0x10   : > { %s996_s22 = scalar_select %p812_p8, 1, 0 }
  0x11   : > { %p518_p9 = pneg %p812_p8  ;;  %s593_s30 = scalar_lea.hbm %s985_s0, 64 }
  0x12   : > { %s998_s27 = scalar_select %p826_p12, 1, 0 }
  0x13   : > { %p822_p11 = pnand %p518_p9, %p800_p3  ;;  %p594_p13 = scmp.ne.s32.totalorder %s985_s0, %s593_s30 }
  0x14   : > { %p600_p5 = scmp.lt.u32.totalorder %s593_s30, %s985_s0 }
  0x15   : > { %p595_p0 = pneg %p822_p11 }
  0x17   : > { %p596_p1 = pnand %p595_p0, %p594_p13 }
  0x19   : > { %p597_p2 = pneg %p596_p1 }
  0x1b   : > { %p602_p4 = pnand %p600_p5, %p597_p2 }
  0x1d   : > { %605 = shalt.err (!%p602_p4)
}
  0x1e   : > { %s606_s8 = scalar_lea.vmem %s155_s24, 64  ;;  %p614_p6 = scmp.lt.s32.totalorder %s155_s24, %s155_s24 }
  0x1f   : > { %p607_p7 = scmp.ne.s32.totalorder %s155_s24, %s606_s8  ;;  %p615_p3 = scmp.lt.s32.totalorder %s606_s8, %s606_s8 }
  0x21   : > { %p609_p9 = pnand %p607_p7, %p595_p0  ;;  %p616_p8 = por %p615_p3, %p614_p6 }
  0x23   : > { %p610_p10 = pneg %p609_p9 }
  0x25   : > { %p617_p12 = pnand %p616_p8, %p610_p10 }
  0x27   : > { %620 = shalt.err (!%p617_p12)
}
  0x28   : > { %521 = dma.hbm_to_vmem [thread:$0]  (!%p822_p11), %s985_s0, 64, %s155_s24, [#allocation4]  }
  0x29   : > { %s27_s11 = sadd.s32 1, %s731_s16  ;;  %s456_s12 = sshll.u32 %s165_s25, 6 }
  0x2a   : > { %p28_p13 = scmp.ge.s32.totalorder %s27_s11, 3  ;;  %s478_s23 = sshll.u32 %s731_s16, 10 }
  0x2b   : > { %s169_s28 = scalar_lea.vmem [#allocation6], %s456_s12  ;;  %s855_s4 = scalar_lea.hbm %s986_s1, %s478_s23 }
  0x2c   : > { %s176_s29 = sshll.u32 %s169_s28, 4  ;;  %s1011_s11 = smov (%p28_p13, %s27_s11), 0  ;;  %s857_s29 = int_to_ptr.vmem [resolvable:$true] %s176_s29 }
  0x2d   : > { %s60_s24 = ssub.s32 %s731_s16, %s1011_s11  ;;  %s867_s6 = scalar_lea.sflag [#allocation7], %s165_s25 }
  0x2e   : > { %p861_p3 = scmp.eq.s32.totalorder %s60_s24, 0  ;;  %s621_s7 = scalar_lea.hbm %s855_s4, 1024 }
  0x2f   : > { %p622_p6 = scmp.ne.s32.totalorder %s855_s4, %s621_s7  ;;  %p1000_p8 = scmp.ne.s32.totalorder %s998_s27, 0 }
  0x30   : > { %s626_s10 = scalar_lea.hbm %s986_s1, 3072  ;;  %p627_p1 = scmp.lt.u32.totalorder %s855_s4, %s986_s1 }
  0x31   : > { %p623_p11 = pneg %p1000_p8  ;;  %p628_p2 = scmp.lt.u32.totalorder %s626_s10, %s621_s7 }
  0x32   : > { %p630_p4 = scmp.lt.u32.totalorder %s621_s7, %s855_s4 }
  0x33   : > { %p624_p12 = pnand %p623_p11, %p622_p6  ;;  %p629_p5 = por %p628_p2, %p627_p1 }
  0x35   : > { %p625_p0 = pneg %p624_p12  ;;  %p631_p7 = por %p630_p4, %p629_p5 }
  0x37   : > { %p632_p9 = pnand %p631_p7, %p625_p0 }
  0x39   : > { %635 = shalt.err (!%p632_p9)
}
  0x3a   : > { %s636_s25 = scalar_lea.vmem %s857_s29, 1024  ;;  %s738_s28 = smov [#allocation6]  }
  0x3b   : > { %p637_p10 = scmp.ne.s32.totalorder %s857_s29, %s636_s25  ;;  %s641_s26 = sshll.u32 %s738_s28, 4  ;;  %s642_s26 = int_to_ptr.vmem [resolvable:$false] %s641_s26 }
  0x3c   : > { %s643_s30 = scalar_lea.vmem %s642_s26, 2048  ;;  %p644_p12 = scmp.lt.s32.totalorder %s857_s29, %s642_s26 }
  0x3d   : > { %p639_p13 = pnand %p637_p10, %p623_p11  ;;  %p645_p1 = scmp.lt.s32.totalorder %s643_s30, %s636_s25 }
  0x3f   : > { %p640_p6 = pneg %p639_p13  ;;  %p646_p2 = por %p645_p1, %p644_p12 }
  0x41   : > { %p647_p5 = pnand %p646_p2, %p640_p6 }
  0x43   : > { %650 = shalt.err (!%p647_p5)
}
  0x44   : > { %s739_s24 = smov 64   ;;  %s740_s7 = smov 4  }
  0x45   : > { %525 = dma.hbm_to_vmem [thread:$0]  (!%p1000_p8), %s855_s4, 1024, %s857_s29, %s867_s6, %s739_s24, %s739_s24, %s740_s7  }
  0x46   : > { %s900_s8 = scalar_select %p861_p3, %s723_s14, %s63_s19  }
  0x47   : > { %p1001_p11 = scmp.ne.s32.totalorder %s996_s22, 0 }
  0x48   : > { %p1002_p0 = scmp.ne.s32.totalorder (!%p1001_p11), %s994_s20, 0 }
  0x49   : > { %194 = sbr.rel (%p1001_p11) target bundleno = 381 (0x17d), region = 32 }
  0x50   : > { %702 = dma.done.wait (%p1002_p0), [#allocation4], 64  }
  0x51   : > { %704 = vsyncadd (%p1002_p0), [#allocation4], 4294967232  ;;  %s200_s9 = sand.u32 1, %s719_s13   ;;  %p1003_p8 = scmp.ne.s32.totalorder %s995_s21, 0 }
  0x52   : > { %s461_s10 = sshll.u32 %s200_s9, 6  ;;  %s201_s12 = scalar_lea.sflag [#allocation7], %s200_s9 }
  0x53   : > { %s909_s27 = scalar_lea.vmem [#allocation6], %s461_s10 }
  0x54   : > { %706 = dma.done.wait (%p1003_p8), %s201_s12, 1024  }
  0x55   : > { %708 = vsyncadd (%p1003_p8), %s201_s12, 4294966272  ;;  %p225_p3 = scmp.lt.s32.totalorder %s727_s15, 2  ;;  %p462_p4 = scmp.ne.s32.totalorder %s727_s15, 0 }
  0x56   : > { %v233_v0 = vld [vmem:[#allocation3] sm:$0xf] (!%p462_p4) }
  0x57   : > { %s917_s19 = scalar_select %p225_p3, %s727_s15, 2 }
  0x58   : > { %232 = sbr.rel (%p462_p4) target bundleno = 95 (0x5f), region = 44  ;;  %234 = vst [vmem:[#allocation2] sm:$0xf] (!%p462_p4), %v233_v0 }
  0x59   : > { %s227_s29 = scalar_lea.vmem %s987_s2, %s917_s19 }
  0x5f PF: > { %v585_v1 = vld [vmem:[%s909_s27] sm:$0xff]   ;;  %v741_v2 = vmov 0.0   ;;  %v586_v3 = vld [vmem:[%s909_s27 + $0x8] sm:$0xff]   ;;  %vm742_vm0 = vmmov 0   ;;  %v587_v4 = vld [vmem:[%s909_s27 + $0x10] sm:$0xff]   ;;  %p472_p7 = scmp.ge.s32.totalorder %s727_s15, 2 }
  0x60   : > { %488 = vmatprep.subr.bf16.mxu0 %v741_v2  ;;  %504 = vmatprep.mubr.msk.bf16.mxu0 %vm742_vm0, %v741_v2  ;;  %v588_v5 = vld [vmem:[%s909_s27 + $0x18] sm:$0xff]   ;;  %v589_v6 = vld [vmem:[%s909_s27 + $0x20] sm:$0xff]   ;;  %v590_v7 = vld [vmem:[%s909_s27 + $0x28] sm:$0xff]  }
  0x61   : > { %489 = vmatpush3.bf16.msra.mxu0 %v585_v1  ;;  %v591_v8 = vld [vmem:[%s909_s27 + $0x30] sm:$0xff]   ;;  %v592_v9 = vld [vmem:[%s909_s27 + $0x38] sm:$0xff]  }
  0x62   : > { %490 = vmatprep.subr.bf16.mxu0 %v741_v2  ;;  %v235_v10 = vld [vmem:[#allocation2] sm:$0xf] }
  0x63   : > { %v463_v11 = vld [vmem:[%s227_s29] ss:$0 sm:$0xff] }
  0x65   : > { %491 = vmatpush3.bf16.msra.mxu0 %v586_v3 }
  0x66   : > { %492 = vmatprep.subr.bf16.mxu0 %v741_v2 }
  0x69   : > { %493 = vmatpush3.bf16.msra.mxu0 %v587_v4 }
  0x6a   : > { %494 = vmatprep.subr.bf16.mxu0 %v741_v2 }
  0x6d   : > { %495 = vmatpush3.bf16.msra.mxu0 %v588_v5 }
  0x6e   : > { %496 = vmatprep.subr.bf16.mxu0 %v741_v2 }
  0x71   : > { %497 = vmatpush3.bf16.msra.mxu0 %v589_v6 }
  0x72   : > { %498 = vmatprep.subr.bf16.mxu0 %v741_v2 }
  0x75   : > { %499 = vmatpush3.bf16.msra.mxu0 %v590_v7 }
  0x76   : > { %500 = vmatprep.subr.bf16.mxu0 %v741_v2 }
  0x79   : > { %501 = vmatpush3.bf16.msra.mxu0 %v591_v8 }
  0x7a   : > { %502 = vmatprep.subr.bf16.mxu0 %v741_v2 }
  0x7d   : > { %503 = vmatpush3.bf16.msra.mxu0 %v592_v9 }
  0x80   : > { %505 = vmatmul.mubr.bf16.vlgmr.msra.gmra.mrb[0].mxu0 %v235_v10 }
 0x150   : > { %351 = sbr.rel (%p472_p7) target bundleno = 347 (0x15b), region = 48 }
 0x153   : > { %v341_v12 = vpop.f32.mrb[0].mxu0 }
 0x154   : > { %v342_v13 = vadd.f32 %v463_v11, %v341_v12  ;;  %v506_v14 = vpop.f32.mrb[1].mxu0 }
 0x155   : > { %v344_v15 = vpop.f32.mrb[2].mxu0 }
 0x156   : > { %v347_v16 = vmax.f32 %v342_v13, 0.0  ;;  %v507_v17 = vpop.f32.mrb[3].mxu0 }
 0x158   : > { %v352_v18 = vpack.c.bf16 %v347_v16, %v347_v16 }
 0x15a   : > { %353 = vst [vmem:[#allocation2] sm:$0xf] %v352_v18 }
 0x15b PF: > { %p473_p9 = scmp.ne.s32.totalorder %s727_s15, 2 }
 0x15c   : > { %358 = vst [vmem:[#allocation8] sm:$0xff] (!%p473_p9), %v347_v16 }
 0x15d   : > { %357 = sbr.rel (%p473_p9) target bundleno = 356 (0x164), region = 52 }
 0x164 PF: > { %p941_p10 = scmp.eq.s32.totalorder %s452_s18, 2  ;;  %s743_s6 = smov [#allocation8]  }
 0x165   : > { %s368_s23 = sshll.u32 %s743_s6, 4  ;;  %s369_s23 = int_to_ptr.vmem [resolvable:$true] %s368_s23 }
 0x166   : > { %s651_s25 = scalar_lea.vmem %s369_s23, 128  ;;  %p658_p1 = scmp.lt.s32.totalorder %s369_s23, %s369_s23 }
 0x167   : > { %p652_p13 = scmp.ne.s32.totalorder %s369_s23, %s651_s25  ;;  %p659_p2 = scmp.lt.s32.totalorder %s651_s25, %s651_s25 }
 0x169   : > { %p653_p6 = pnand %p652_p13, %p941_p10  ;;  %p660_p5 = por %p659_p2, %p658_p1 }
 0x16b   : > { %p654_p12 = pneg %p653_p6 }
 0x16d   : > { %p661_p11 = pnand %p660_p5, %p654_p12 }
 0x16f   : > { %664 = shalt.err (!%p661_p11)
}
 0x170   : > { %s665_s18 = scalar_lea.hbm %s988_s3, 128 }
 0x171   : > { %p666_p0 = scmp.ne.s32.totalorder %s988_s3, %s665_s18  ;;  %p671_p4 = scmp.lt.u32.totalorder %s665_s18, %s988_s3 }
 0x173   : > { %p667_p8 = pnand %p666_p0, %p941_p10 }
 0x175   : > { %p668_p3 = pneg %p667_p8 }
 0x177   : > { %p673_p7 = pnand %p671_p4, %p668_p3 }
 0x179   : > { %676 = shalt.err (!%p673_p7)
}
 0x17a   : > { %515 = dma.vmem_to_hbm [thread:$0]  (%p941_p10), %s369_s23, 128, %s988_s3, [#allocation5]  }
 0x17b   : > { %710 = dma.done.wait (%p941_p10), [#allocation5], 128  }
 0x17c   : > { %712 = vsyncadd (%p941_p10), [#allocation5], 4294967168 }
 0x17d PF: > { %s18_s17 = sadd.s32 1, %s735_s17   ;;  %s1005_s12 = smov %s719_s13 }
 0x17e   : > { %p15_p9 = scmp.ge.s32.totalorder %s18_s17, 5   ;;  %s1006_s13 = smov %s723_s14 }
 0x17f   : > { %s1007_s14 = smov %s900_s8  ;;  %s1008_s15 = smov %s731_s16 }
 0x180   : > { %s1009_s16 = smov %s1011_s11  ;;  %17 = sbr.rel (!%p15_p9) target bundleno = 6 (0x6), region = 91 }
 0x187   :  { %381 = vsyncpa [#allocation4], 1 }
 0x188   :  { %383 = vsyncpa [#allocation4 + $0x1], 1 }
 0x189   :  { %384 = vsyncpa [#allocation7], 1 }
 0x18a   :  { %386 = vsyncpa [#allocation7 + $0x1], 1 }
 0x18b   :  { %387 = vsyncpa [#allocation5], 1 }
 0x18c   :  { %389 = vsyncpa [#allocation5 + $0x1], 1 }

</bundles_post_ra>
